<compile_context>
chip_gen: v6e
topology: v6e:2x2x1
jax: 0.10.0
libtpu: 0.0.40
codegen_flags: <defaults>
</compile_context>

<pallas_src>
import functools

import jax
import jax.numpy as jnp
from jax.experimental import pallas as pl
from jax.experimental.pallas import tpu as pltpu


def _round_up(x: int, m: int) -> int:
    return (x + m - 1) // m * m


_SQRT_HALF = 0.7071067811865476


def _layernorm_f32(x_ref, gamma_ref, beta_ref, eps: float, d_real: int):
    """LayerNorm over the (possibly padded) last dim; stats use the real D."""
    x = x_ref[...].astype(jnp.float32)                      # (rows, Dp)
    d_pad = x.shape[-1]
    inv_d = jnp.float32(1.0 / d_real)

    # Padded lanes of x are zero, so the sum over the padded axis equals the
    # sum over the real D features.
    mean = jnp.sum(x, axis=-1, keepdims=True) * inv_d
    xc = x - mean
    if d_pad != d_real:
        # (1, Dp) mask broadcast in the where — avoids a full (rows, Dp) iota.
        lane = jax.lax.broadcasted_iota(jnp.int32, (1, d_pad), 1)
        xc = jnp.where(lane < d_real, xc, jnp.float32(0.0))
    var = jnp.sum(xc * xc, axis=-1, keepdims=True) * inv_d  # biased, like torch
    xn = xc * jax.lax.rsqrt(var + jnp.float32(eps))
    return xn * gamma_ref[...].astype(jnp.float32) + beta_ref[...].astype(jnp.float32)


def _gelu(h, approximate: bool):
    if approximate:
        # tanh form -> EUP slot (mostly idle); use when VALU-bound.
        return jax.nn.gelu(h, approximate=True)
    # Exact erf form == torch.nn.GELU default.
    return 0.5 * h * (1.0 + jax.lax.erf(h * jnp.float32(_SQRT_HALF)))


# --------------------------------------------------------------------------- #
# Kernel 1: weights fully resident in VMEM, 1-D grid over row tiles.
# --------------------------------------------------------------------------- #
def _ffn_kernel_resident(x_ref, gamma_ref, beta_ref, w1_ref, b1_ref, w2_ref,
                         b2_ref, o_ref, *, eps: float, d_real: int,
                         approx_gelu: bool):
    xn = _layernorm_f32(x_ref, gamma_ref, beta_ref, eps, d_real)

    h = jnp.dot(xn.astype(w1_ref.dtype), w1_ref[...],
                preferred_element_type=jnp.float32)
    h = h + b1_ref[...].astype(jnp.float32)
    # Cast in the same expression so the f32 `h` is dead before the 2nd matmul.
    h = _gelu(h, approx_gelu).astype(w2_ref.dtype)

    out = jnp.dot(h, w2_ref[...], preferred_element_type=jnp.float32)
    out = out + b2_ref[...].astype(jnp.float32)
    o_ref[...] = out.astype(o_ref.dtype)


# --------------------------------------------------------------------------- #
# Kernel 2: hidden dim tiled, 2-D grid (row tiles, hidden tiles), accumulator.
# --------------------------------------------------------------------------- #
def _ffn_kernel_htiled(x_ref, gamma_ref, beta_ref, w1_ref, b1_ref, w2_ref,
                       b2_ref, o_ref, xn_ref, acc_ref, *, eps: float,
                       d_real: int, approx_gelu: bool):
    j = pl.program_id(1)

    @pl.when(j == 0)
    def _():
        xn = _layernorm_f32(x_ref, gamma_ref, beta_ref, eps, d_real)
        xn_ref[...] = xn.astype(xn_ref.dtype)
        acc_ref[...] = jnp.zeros_like(acc_ref)

    h = jnp.dot(xn_ref[...], w1_ref[...], preferred_element_type=jnp.float32)
    h = h + b1_ref[...].astype(jnp.float32)
    h = _gelu(h, approx_gelu).astype(w2_ref.dtype)
    acc_ref[...] += jnp.dot(h, w2_ref[...], preferred_element_type=jnp.float32)

    @pl.when(j == pl.num_programs(1) - 1)
    def _():
        o_ref[...] = (acc_ref[...] + b2_ref[...].astype(jnp.float32)).astype(o_ref.dtype)


def _vmem_cap_bytes() -> int:
    """Per-generation VMEM capacity; conservative (v7x) default if unknown."""
    try:
        info = pltpu.get_tpu_info()
        cap = int(getattr(info, "vmem_capacity_bytes", 0))
        if cap > 0:
            return cap
    except Exception:  # pragma: no cover - query unsupported on this backend
        pass
    return 64 << 20


def feed_forward(x, gamma, beta, w1, b1, w2, b2, *, eps=1e-5, row_tile=512,
                 weights_dtype=None, approximate_gelu=False,
                 force_h_tiling=False):
    """x: (B, N, D). Weights: w1 (D, 2D), w2 (2D, D). Returns (B, N, D)."""
    B, N, D = x.shape
    H = w1.shape[1]
    M = B * N

    if weights_dtype is not None:
        # MXU fast path (e.g. bf16); f32 accumulation is kept in the kernel.
        w1 = w1.astype(weights_dtype)
        w2 = w2.astype(weights_dtype)

    x_bytes = jnp.dtype(x.dtype).itemsize
    w_bytes = jnp.dtype(w1.dtype).itemsize

    # Lane-dense feature dims, tile-aligned row dim (16-row granularity for
    # packed bf16 activations, 8 for f32).
    Dp = _round_up(D, 128)
    Hp = _round_up(H, 128)
    row_gran = 16 if x.dtype == jnp.bfloat16 else 8
    row_tile = max(row_gran, min(int(row_tile), _round_up(M, row_gran)))
    row_tile = _round_up(row_tile, row_gran)
    # Guarantee >= 2 row-grid steps when possible so both v7x TCs get work.
    if _round_up(M, row_tile) // row_tile < 2 and row_tile > row_gran:
        row_tile = max(row_gran, _round_up(row_tile // 2, row_gran))
    Mp = _round_up(M, row_tile)

    # ---- Generation-aware VMEM budgeting ----------------------------------
    cap = _vmem_cap_bytes()
    usable = max(cap - (8 << 20), 32 << 20)

    io_tiles = 2 * 2 * row_tile * Dp * x_bytes            # double-buffered x/out
    resident_weights = 2 * Dp * Hp * w_bytes + (Hp + 2 * Dp) * w_bytes + 2 * Dp * 4
    resident_interm = row_tile * (2 * Dp + Hp) * 4 + row_tile * Hp * w_bytes
    resident_est = resident_weights + io_tiles + resident_interm + (2 << 20)

    def h_est(t):
        wt = 2 * 2 * Dp * t * w_bytes                     # double-buffered w1/w2 tiles
        bt = 2 * t * w_bytes + 3 * Dp * 4
        scr = row_tile * Dp * (w_bytes + 4)               # xn scratch + f32 acc
        interm = 2 * row_tile * t * 4
        return wt + bt + scr + io_tiles + interm + (2 << 20)

    use_h_tiling = bool(force_h_tiling) or resident_est > usable
    if use_h_tiling:
        th = min(Hp, 1024)
        while th > 128 and h_est(th) > usable:
            th = max(128, _round_up(th // 2, 128))
        Hp_use = _round_up(Hp, th)                        # zero-padded hidden cols are exact no-ops
        vmem_limit = int(min(usable, max(h_est(th), 32 << 20)))
    else:
        th = None
        Hp_use = Hp
        vmem_limit = int(min(usable, max(resident_est, 32 << 20)))

    # ---- Pad operands to the lane/tile-aligned shapes ----------------------
    x2d = x.reshape(M, D)
    if Mp != M or Dp != D:
        x2d = jnp.pad(x2d, ((0, Mp - M), (0, Dp - D)))
    gamma_p = jnp.pad(gamma, (0, Dp - D)).reshape(1, Dp)
    beta_p = jnp.pad(beta, (0, Dp - D)).reshape(1, Dp)
    w1_p = jnp.pad(w1, ((0, Dp - D), (0, Hp_use - H)))
    b1_p = jnp.pad(b1, (0, Hp_use - H)).reshape(1, Hp_use)
    w2_p = jnp.pad(w2, ((0, Hp_use - H), (0, Dp - D)))
    b2_p = jnp.pad(b2, (0, Dp - D)).reshape(1, Dp)

    cost = pl.CostEstimate(
        flops=int(4 * M * D * H),
        transcendentals=int(M * H),
        bytes_accessed=int(2 * M * D * x_bytes + 2 * D * H * w_bytes + (2 * D + H) * 4),
    )

    def _call(buffer_constants: bool):
        def const_spec(shape, index_map):
            if buffer_constants:
                # Constant index_map -> single-buffering halves resident VMEM.
                return pl.BlockSpec(shape, index_map, pipeline_mode=pl.Buffered(1))
            return pl.BlockSpec(shape, index_map)

        if use_h_tiling:
            kernel = functools.partial(_ffn_kernel_htiled, eps=eps, d_real=D,
                                       approx_gelu=approximate_gelu)
            grid = (Mp // row_tile, Hp_use // th)
            in_specs = [
                pl.BlockSpec((row_tile, Dp), lambda i, j: (i, 0)),       # x rows
                const_spec((1, Dp), lambda i, j: (0, 0)),                # gamma
                const_spec((1, Dp), lambda i, j: (0, 0)),                # beta
                pl.BlockSpec((Dp, th), lambda i, j: (0, j)),             # w1 tile
                pl.BlockSpec((1, th), lambda i, j: (0, j)),              # b1 tile
                pl.BlockSpec((th, Dp), lambda i, j: (j, 0)),             # w2 tile
                const_spec((1, Dp), lambda i, j: (0, 0)),                # b2
            ]
            out_specs = pl.BlockSpec((row_tile, Dp), lambda i, j: (i, 0))
            scratch_shapes = [pltpu.VMEM((row_tile, Dp), w1.dtype),      # xn
                              pltpu.VMEM((row_tile, Dp), jnp.float32)]   # acc
            dims = ("parallel", "arbitrary")
        else:
            kernel = functools.partial(_ffn_kernel_resident, eps=eps, d_real=D,
                                       approx_gelu=approximate_gelu)
            grid = (Mp // row_tile,)
            in_specs = [
                pl.BlockSpec((row_tile, Dp), lambda i: (i, 0)),          # x rows
                const_spec((1, Dp), lambda i: (0, 0)),                   # gamma
                const_spec((1, Dp), lambda i: (0, 0)),                   # beta
                const_spec((Dp, Hp_use), lambda i: (0, 0)),              # w1
                const_spec((1, Hp_use), lambda i: (0, 0)),               # b1
                const_spec((Hp_use, Dp), lambda i: (0, 0)),              # w2
                const_spec((1, Dp), lambda i: (0, 0)),                   # b2
            ]
            out_specs = pl.BlockSpec((row_tile, Dp), lambda i: (i, 0))
            scratch_shapes = []
            dims = ("parallel",)

        return pl.pallas_call(
            kernel,
            out_shape=jax.ShapeDtypeStruct((Mp, Dp), x.dtype),
            grid_spec=pltpu.PrefetchScalarGridSpec(
                num_scalar_prefetch=0,
                grid=grid,
                in_specs=in_specs,
                out_specs=out_specs,
                scratch_shapes=scratch_shapes),
            compiler_params=pltpu.CompilerParams(
                dimension_semantics=dims,
                vmem_limit_bytes=vmem_limit),
            cost_estimate=cost,
        )(x2d, gamma_p, beta_p, w1_p, b1_p, w2_p, b2_p)

    try:
        out2d = _call(True)
    except Exception:
        # Fallback for environments where pipeline_mode=pl.Buffered(1) is not
        # supported; identical semantics, just double-buffered constants.
        out2d = _call(False)

    return out2d[:M, :D].reshape(B, N, D)


def _reference(x, gamma, beta, w1, b1, w2, b2, eps=1e-5):
    xf = x.astype(jnp.float32)
    mean = jnp.mean(xf, axis=-1, keepdims=True)
    var = jnp.mean((xf - mean) ** 2, axis=-1, keepdims=True)
    xn = (xf - mean) * jax.lax.rsqrt(var + eps) * gamma + beta
    h = xn @ w1 + b1
    h = jax.nn.gelu(h, approximate=False)
    return (h @ w2 + b2).astype(x.dtype)


if __name__ == "__main__":
    # Small shapes consistent with FeedForward(dim): tokens of width `dim`.
    B, N, D = 2, 8, 32
    H = D * 2

    key = jax.random.PRNGKey(0)
    kx, kg, kb, kw1, kb1, kw2, kb2 = jax.random.split(key, 7)

    x = jax.random.normal(kx, (B, N, D), dtype=jnp.float32)

    # Deterministic synthetic parameters (LayerNorm affine + two Linears).
    gamma = 1.0 + 0.02 * jax.random.normal(kg, (D,), dtype=jnp.float32)
    beta = 0.02 * jax.random.normal(kb, (D,), dtype=jnp.float32)
    w1 = 0.1 * jax.random.normal(kw1, (D, H), dtype=jnp.float32)   # (in, out)
    b1 = 0.1 * jax.random.normal(kb1, (H,), dtype=jnp.float32)
    w2 = 0.1 * jax.random.normal(kw2, (H, D), dtype=jnp.float32)   # (in, out)
    b2 = 0.1 * jax.random.normal(kb2, (D,), dtype=jnp.float32)

    ref = _reference(x, gamma, beta, w1, b1, w2, b2)

    # 1) Default (weights-resident) path, f32 weights: tight tolerance.
    out = jax.block_until_ready(feed_forward(x, gamma, beta, w1, b1, w2, b2))
    assert out.shape == (B, N, D)
    assert jnp.allclose(out, ref, atol=1e-5, rtol=1e-5), "resident path mismatch"

    # 2) H-tiled accumulator path (VMEM fallback for large D / v7x): exact too.
    out_h = jax.block_until_ready(
        feed_forward(x, gamma, beta, w1, b1, w2, b2, force_h_tiling=True))
    assert jnp.allclose(out_h, ref, atol=1e-5, rtol=1e-5), "H-tiled path mismatch"

    # 3) bf16 weights (MXU fast path): standard mixed-precision tolerance.
    out_bf = jax.block_until_ready(
        feed_forward(x, gamma, beta, w1, b1, w2, b2, weights_dtype=jnp.bfloat16))
    assert jnp.allclose(out_bf, ref, atol=3e-2, rtol=3e-2), "bf16 path mismatch"

    print("KERNEL_OK")
</pallas_src>

<mosaic_0001>
module attributes {stable_mosaic.version = 11 : i64} {
  func.func @_ffn_kernel_resident(%arg0: i32, %arg1: memref<8x128xf32, #tpu.memory_space<vmem>>, %arg2: memref<1x128xf32, #tpu.memory_space<vmem>>, %arg3: memref<1x128xf32, #tpu.memory_space<vmem>>, %arg4: memref<128x128xf32, #tpu.memory_space<vmem>>, %arg5: memref<1x128xf32, #tpu.memory_space<vmem>>, %arg6: memref<128x128xf32, #tpu.memory_space<vmem>>, %arg7: memref<1x128xf32, #tpu.memory_space<vmem>>, %arg8: memref<8x128xf32, #tpu.memory_space<vmem>>) attributes {dimension_semantics = [#tpu.dimension_semantics<parallel>], iteration_bounds = array<i64: 2>, scalar_prefetch = 0 : i64, scratch_operands = 0 : i64, tpu.core_type = #tpu.core_type<tc>, window_params = [{transform_indices = @transform_0, window_bounds = array<i64: 8, 128>}, {pipeline_mode = #tpu.pipeline_mode<synchronous>, transform_indices = @transform_1, window_bounds = array<i64: 1, 128>}, {pipeline_mode = #tpu.pipeline_mode<synchronous>, transform_indices = @transform_2, window_bounds = array<i64: 1, 128>}, {pipeline_mode = #tpu.pipeline_mode<synchronous>, transform_indices = @transform_3, window_bounds = array<i64: 128, 128>}, {pipeline_mode = #tpu.pipeline_mode<synchronous>, transform_indices = @transform_4, window_bounds = array<i64: 1, 128>}, {pipeline_mode = #tpu.pipeline_mode<synchronous>, transform_indices = @transform_5, window_bounds = array<i64: 128, 128>}, {pipeline_mode = #tpu.pipeline_mode<synchronous>, transform_indices = @transform_6, window_bounds = array<i64: 1, 128>}, {transform_indices = @transform_7, window_bounds = array<i64: 8, 128>}]} {
    %c0 = arith.constant 0 : index
    %c0_0 = arith.constant 0 : index
    %0 = vector.load %arg1[%c0, %c0_0] : memref<8x128xf32, #tpu.memory_space<vmem>>, vector<8x128xf32>
    %cst = arith.constant dense<0.000000e+00> : vector<8xf32>
    %1 = vector.multi_reduction <add>, %0, %cst [1] : vector<8x128xf32> to vector<8xf32>
    %2 = vector.shape_cast %1 : vector<8xf32> to vector<8x1xf32>
    %cst_1 = arith.constant 3.125000e-02 : f32
    %3 = vector.broadcast %cst_1 : f32 to vector<8x1xf32>
    %4 = arith.mulf %2, %3 : vector<8x1xf32>
    %5 = vector.broadcast %4 : vector<8x1xf32> to vector<8x128xf32>
    %6 = arith.subf %0, %5 : vector<8x128xf32>
    %7 = tpu.iota {dimensions = array<i32: 1>} : vector<1x128xi32>
    %c32_i32 = arith.constant 32 : i32
    %8 = vector.broadcast %c32_i32 : i32 to vector<1x128xi32>
    %9 = arith.cmpi slt, %7, %8 : vector<1x128xi32>
    %cst_2 = arith.constant 0.000000e+00 : f32
    %10 = vector.shape_cast %9 : vector<1x128xi1> to vector<1x128xi1>
    %11 = vector.broadcast %10 : vector<1x128xi1> to vector<8x128xi1>
    %12 = vector.broadcast %cst_2 : f32 to vector<8x128xf32>
    %13 = arith.select %11, %6, %12 : vector<8x128xi1>, vector<8x128xf32>
    %14 = arith.mulf %13, %13 : vector<8x128xf32>
    %cst_3 = arith.constant dense<0.000000e+00> : vector<8xf32>
    %15 = vector.multi_reduction <add>, %14, %cst_3 [1] : vector<8x128xf32> to vector<8xf32>
    %16 = vector.shape_cast %15 : vector<8xf32> to vector<8x1xf32>
    %cst_4 = arith.constant 3.125000e-02 : f32
    %17 = vector.broadcast %cst_4 : f32 to vector<8x1xf32>
    %18 = arith.mulf %16, %17 : vector<8x1xf32>
    %cst_5 = arith.constant 9.99999974E-6 : f32
    %19 = vector.broadcast %cst_5 : f32 to vector<8x1xf32>
    %20 = arith.addf %18, %19 : vector<8x1xf32>
    %21 = math.rsqrt %20 : vector<8x1xf32>
    %22 = vector.broadcast %21 : vector<8x1xf32> to vector<8x128xf32>
    %23 = arith.mulf %13, %22 : vector<8x128xf32>
    %c0_6 = arith.constant 0 : index
    %c0_7 = arith.constant 0 : index
    %24 = vector.load %arg2[%c0_6, %c0_7] : memref<1x128xf32, #tpu.memory_space<vmem>>, vector<1x128xf32>
    %25 = vector.broadcast %24 : vector<1x128xf32> to vector<8x128xf32>
    %26 = arith.mulf %23, %25 : vector<8x128xf32>
    %c0_8 = arith.constant 0 : index
    %c0_9 = arith.constant 0 : index
    %27 = vector.load %arg3[%c0_8, %c0_9] : memref<1x128xf32, #tpu.memory_space<vmem>>, vector<1x128xf32>
    %28 = vector.broadcast %27 : vector<1x128xf32> to vector<8x128xf32>
    %29 = arith.addf %26, %28 : vector<8x128xf32>
    %c0_10 = arith.constant 0 : index
    %c0_11 = arith.constant 0 : index
    %30 = vector.load %arg4[%c0_10, %c0_11] : memref<128x128xf32, #tpu.memory_space<vmem>>, vector<128x128xf32>
    %cst_12 = arith.constant dense<0.000000e+00> : vector<8x128xf32>
    %31 = tpu.matmul %29, %30, %cst_12 {dimension_numbers = #tpu.dot_dimension_numbers<[1], [0], [0], [1], [0, 0, 1, 1], [], []>} : vector<8x128xf32>, vector<128x128xf32>, vector<8x128xf32> -> vector<8x128xf32>
    %c0_13 = arith.constant 0 : index
    %c0_14 = arith.constant 0 : index
    %32 = vector.load %arg5[%c0_13, %c0_14] : memref<1x128xf32, #tpu.memory_space<vmem>>, vector<1x128xf32>
    %33 = vector.broadcast %32 : vector<1x128xf32> to vector<8x128xf32>
    %34 = arith.addf %31, %33 : vector<8x128xf32>
    %cst_15 = arith.constant 5.000000e-01 : f32
    %35 = vector.broadcast %cst_15 : f32 to vector<8x128xf32>
    %36 = arith.mulf %35, %34 : vector<8x128xf32>
    %cst_16 = arith.constant 0.707106769 : f32
    %37 = vector.broadcast %cst_16 : f32 to vector<8x128xf32>
    %38 = arith.mulf %34, %37 : vector<8x128xf32>
    %39 = math.erf %38 : vector<8x128xf32>
    %cst_17 = arith.constant 1.000000e+00 : f32
    %40 = vector.broadcast %cst_17 : f32 to vector<8x128xf32>
    %41 = arith.addf %40, %39 : vector<8x128xf32>
    %42 = arith.mulf %36, %41 : vector<8x128xf32>
    %c0_18 = arith.constant 0 : index
    %c0_19 = arith.constant 0 : index
    %43 = vector.load %arg6[%c0_18, %c0_19] : memref<128x128xf32, #tpu.memory_space<vmem>>, vector<128x128xf32>
    %cst_20 = arith.constant dense<0.000000e+00> : vector<8x128xf32>
    %44 = tpu.matmul %42, %43, %cst_20 {dimension_numbers = #tpu.dot_dimension_numbers<[1], [0], [0], [1], [0, 0, 1, 1], [], []>} : vector<8x128xf32>, vector<128x128xf32>, vector<8x128xf32> -> vector<8x128xf32>
    %c0_21 = arith.constant 0 : index
    %c0_22 = arith.constant 0 : index
    %45 = vector.load %arg7[%c0_21, %c0_22] : memref<1x128xf32, #tpu.memory_space<vmem>>, vector<1x128xf32>
    %46 = vector.broadcast %45 : vector<1x128xf32> to vector<8x128xf32>
    %47 = arith.addf %44, %46 : vector<8x128xf32>
    %c0_23 = arith.constant 0 : index
    %c0_24 = arith.constant 0 : index
    %48 = vector.load %arg8[%c0_23, %c0_24] : memref<8x128xf32, #tpu.memory_space<vmem>>, vector<8x128xf32>
    tpu.vector_store %arg8[%c0_23, %c0_24], %47 {strides = array<i32>} : memref<8x128xf32, #tpu.memory_space<vmem>>, vector<8x128xf32>,
    return
  }
  func.func @transform_0(%arg0: i32) -> (i32, i32) {
    %c0_i32 = arith.constant 0 : i32
    %c0_i32_0 = arith.constant 0 : i32
    return %arg0, %c0_i32 : i32, i32
  }
  func.func @transform_1(%arg0: i32) -> (i32, i32) {
    %c0_i32 = arith.constant 0 : i32
    %c0_i32_0 = arith.constant 0 : i32
    %c0_i32_1 = arith.constant 0 : i32
    return %c0_i32, %c0_i32_0 : i32, i32
  }
  func.func @transform_2(%arg0: i32) -> (i32, i32) {
    %c0_i32 = arith.constant 0 : i32
    %c0_i32_0 = arith.constant 0 : i32
    %c0_i32_1 = arith.constant 0 : i32
    return %c0_i32, %c0_i32_0 : i32, i32
  }
  func.func @transform_3(%arg0: i32) -> (i32, i32) {
    %c0_i32 = arith.constant 0 : i32
    %c0_i32_0 = arith.constant 0 : i32
    %c0_i32_1 = arith.constant 0 : i32
    return %c0_i32, %c0_i32_0 : i32, i32
  }
  func.func @transform_4(%arg0: i32) -> (i32, i32) {
    %c0_i32 = arith.constant 0 : i32
    %c0_i32_0 = arith.constant 0 : i32
    %c0_i32_1 = arith.constant 0 : i32
    return %c0_i32, %c0_i32_0 : i32, i32
  }
  func.func @transform_5(%arg0: i32) -> (i32, i32) {
    %c0_i32 = arith.constant 0 : i32
    %c0_i32_0 = arith.constant 0 : i32
    %c0_i32_1 = arith.constant 0 : i32
    return %c0_i32, %c0_i32_0 : i32, i32
  }
  func.func @transform_6(%arg0: i32) -> (i32, i32) {
    %c0_i32 = arith.constant 0 : i32
    %c0_i32_0 = arith.constant 0 : i32
    %c0_i32_1 = arith.constant 0 : i32
    return %c0_i32, %c0_i32_0 : i32, i32
  }
  func.func @transform_7(%arg0: i32) -> (i32, i32) {
    %c0_i32 = arith.constant 0 : i32
    %c0_i32_0 = arith.constant 0 : i32
    return %arg0, %c0_i32 : i32, i32
  }
}

module attributes {stable_mosaic.version = 11 : i64} {
  func.func @_ffn_kernel_resident(%arg0: i32, %arg1: memref<8x128xf32, #tpu.memory_space<vmem>>, %arg2: memref<1x128xf32, #tpu.memory_space<vmem>>, %arg3: memref<1x128xf32, #tpu.memory_space<vmem>>, %arg4: memref<128x128xf32, #tpu.memory_space<vmem>>, %arg5: memref<1x128xf32, #tpu.memory_space<vmem>>, %arg6: memref<128x128xf32, #tpu.memory_space<vmem>>, %arg7: memref<1x128xf32, #tpu.memory_space<vmem>>, %arg8: memref<8x128xf32, #tpu.memory_space<vmem>>) attributes {dimension_semantics = [#tpu.dimension_semantics<parallel>], iteration_bounds = array<i64: 2>, scalar_prefetch = 0 : i64, scratch_operands = 0 : i64, tpu.core_type = #tpu.core_type<tc>, window_params = [{transform_indices = @transform_0, window_bounds = array<i64: 8, 128>}, {pipeline_mode = #tpu.pipeline_mode<synchronous>, transform_indices = @transform_1, window_bounds = array<i64: 1, 128>}, {pipeline_mode = #tpu.pipeline_mode<synchronous>, transform_indices = @transform_2, window_bounds = array<i64: 1, 128>}, {pipeline_mode = #tpu.pipeline_mode<synchronous>, transform_indices = @transform_3, window_bounds = array<i64: 128, 128>}, {pipeline_mode = #tpu.pipeline_mode<synchronous>, transform_indices = @transform_4, window_bounds = array<i64: 1, 128>}, {pipeline_mode = #tpu.pipeline_mode<synchronous>, transform_indices = @transform_5, window_bounds = array<i64: 128, 128>}, {pipeline_mode = #tpu.pipeline_mode<synchronous>, transform_indices = @transform_6, window_bounds = array<i64: 1, 128>}, {transform_indices = @transform_7, window_bounds = array<i64: 8, 128>}]} {
    %c0 = arith.constant 0 : index
    %c0_0 = arith.constant 0 : index
    %0 = vector.load %arg1[%c0, %c0_0] : memref<8x128xf32, #tpu.memory_space<vmem>>, vector<8x128xf32>
    %cst = arith.constant dense<0.000000e+00> : vector<8xf32>
    %1 = vector.multi_reduction <add>, %0, %cst [1] : vector<8x128xf32> to vector<8xf32>
    %2 = vector.shape_cast %1 : vector<8xf32> to vector<8x1xf32>
    %cst_1 = arith.constant 3.125000e-02 : f32
    %3 = vector.broadcast %cst_1 : f32 to vector<8x1xf32>
    %4 = arith.mulf %2, %3 : vector<8x1xf32>
    %5 = vector.broadcast %4 : vector<8x1xf32> to vector<8x128xf32>
    %6 = arith.subf %0, %5 : vector<8x128xf32>
    %7 = tpu.iota {dimensions = array<i32: 1>} : vector<1x128xi32>
    %c32_i32 = arith.constant 32 : i32
    %8 = vector.broadcast %c32_i32 : i32 to vector<1x128xi32>
    %9 = arith.cmpi slt, %7, %8 : vector<1x128xi32>
    %cst_2 = arith.constant 0.000000e+00 : f32
    %10 = vector.shape_cast %9 : vector<1x128xi1> to vector<1x128xi1>
    %11 = vector.broadcast %10 : vector<1x128xi1> to vector<8x128xi1>
    %12 = vector.broadcast %cst_2 : f32 to vector<8x128xf32>
    %13 = arith.select %11, %6, %12 : vector<8x128xi1>, vector<8x128xf32>
    %14 = arith.mulf %13, %13 : vector<8x128xf32>
    %cst_3 = arith.constant dense<0.000000e+00> : vector<8xf32>
    %15 = vector.multi_reduction <add>, %14, %cst_3 [1] : vector<8x128xf32> to vector<8xf32>
    %16 = vector.shape_cast %15 : vector<8xf32> to vector<8x1xf32>
    %cst_4 = arith.constant 3.125000e-02 : f32
    %17 = vector.broadcast %cst_4 : f32 to vector<8x1xf32>
    %18 = arith.mulf %16, %17 : vector<8x1xf32>
    %cst_5 = arith.constant 9.99999974E-6 : f32
    %19 = vector.broadcast %cst_5 : f32 to vector<8x1xf32>
    %20 = arith.addf %18, %19 : vector<8x1xf32>
    %21 = math.rsqrt %20 : vector<8x1xf32>
    %22 = vector.broadcast %21 : vector<8x1xf32> to vector<8x128xf32>
    %23 = arith.mulf %13, %22 : vector<8x128xf32>
    %c0_6 = arith.constant 0 : index
    %c0_7 = arith.constant 0 : index
    %24 = vector.load %arg2[%c0_6, %c0_7] : memref<1x128xf32, #tpu.memory_space<vmem>>, vector<1x128xf32>
    %25 = vector.broadcast %24 : vector<1x128xf32> to vector<8x128xf32>
    %26 = arith.mulf %23, %25 : vector<8x128xf32>
    %c0_8 = arith.constant 0 : index
    %c0_9 = arith.constant 0 : index
    %27 = vector.load %arg3[%c0_8, %c0_9] : memref<1x128xf32, #tpu.memory_space<vmem>>, vector<1x128xf32>
    %28 = vector.broadcast %27 : vector<1x128xf32> to vector<8x128xf32>
    %29 = arith.addf %26, %28 : vector<8x128xf32>
    %c0_10 = arith.constant 0 : index
    %c0_11 = arith.constant 0 : index
    %30 = vector.load %arg4[%c0_10, %c0_11] : memref<128x128xf32, #tpu.memory_space<vmem>>, vector<128x128xf32>
    %cst_12 = arith.constant dense<0.000000e+00> : vector<8x128xf32>
    %31 = tpu.matmul %29, %30, %cst_12 {dimension_numbers = #tpu.dot_dimension_numbers<[1], [0], [0], [1], [0, 0, 1, 1], [], []>} : vector<8x128xf32>, vector<128x128xf32>, vector<8x128xf32> -> vector<8x128xf32>
    %c0_13 = arith.constant 0 : index
    %c0_14 = arith.constant 0 : index
    %32 = vector.load %arg5[%c0_13, %c0_14] : memref<1x128xf32, #tpu.memory_space<vmem>>, vector<1x128xf32>
    %33 = vector.broadcast %32 : vector<1x128xf32> to vector<8x128xf32>
    %34 = arith.addf %31, %33 : vector<8x128xf32>
    %cst_15 = arith.constant 5.000000e-01 : f32
    %35 = vector.broadcast %cst_15 : f32 to vector<8x128xf32>
    %36 = arith.mulf %35, %34 : vector<8x128xf32>
    %cst_16 = arith.constant 0.707106769 : f32
    %37 = vector.broadcast %cst_16 : f32 to vector<8x128xf32>
    %38 = arith.mulf %34, %37 : vector<8x128xf32>
    %39 = math.erf %38 : vector<8x128xf32>
    %cst_17 = arith.constant 1.000000e+00 : f32
    %40 = vector.broadcast %cst_17 : f32 to vector<8x128xf32>
    %41 = arith.addf %40, %39 : vector<8x128xf32>
    %42 = arith.mulf %36, %41 : vector<8x128xf32>
    %c0_18 = arith.constant 0 : index
    %c0_19 = arith.constant 0 : index
    %43 = vector.load %arg6[%c0_18, %c0_19] : memref<128x128xf32, #tpu.memory_space<vmem>>, vector<128x128xf32>
    %cst_20 = arith.constant dense<0.000000e+00> : vector<8x128xf32>
    %44 = tpu.matmul %42, %43, %cst_20 {dimension_numbers = #tpu.dot_dimension_numbers<[1], [0], [0], [1], [0, 0, 1, 1], [], []>} : vector<8x128xf32>, vector<128x128xf32>, vector<8x128xf32> -> vector<8x128xf32>
    %c0_21 = arith.constant 0 : index
    %c0_22 = arith.constant 0 : index
    %45 = vector.load %arg7[%c0_21, %c0_22] : memref<1x128xf32, #tpu.memory_space<vmem>>, vector<1x128xf32>
    %46 = vector.broadcast %45 : vector<1x128xf32> to vector<8x128xf32>
    %47 = arith.addf %44, %46 : vector<8x128xf32>
    %c0_23 = arith.constant 0 : index
    %c0_24 = arith.constant 0 : index
    %48 = vector.load %arg8[%c0_23, %c0_24] : memref<8x128xf32, #tpu.memory_space<vmem>>, vector<8x128xf32>
    tpu.vector_store %arg8[%c0_23, %c0_24], %47 {strides = array<i32>} : memref<8x128xf32, #tpu.memory_space<vmem>>, vector<8x128xf32>,
    return
  }
  func.func @transform_0(%arg0: i32) -> (i32, i32) {
    %c0_i32 = arith.constant 0 : i32
    %c0_i32_0 = arith.constant 0 : i32
    return %arg0, %c0_i32 : i32, i32
  }
  func.func @transform_1(%arg0: i32) -> (i32, i32) {
    %c0_i32 = arith.constant 0 : i32
    %c0_i32_0 = arith.constant 0 : i32
    %c0_i32_1 = arith.constant 0 : i32
    return %c0_i32, %c0_i32_0 : i32, i32
  }
  func.func @transform_2(%arg0: i32) -> (i32, i32) {
    %c0_i32 = arith.constant 0 : i32
    %c0_i32_0 = arith.constant 0 : i32
    %c0_i32_1 = arith.constant 0 : i32
    return %c0_i32, %c0_i32_0 : i32, i32
  }
  func.func @transform_3(%arg0: i32) -> (i32, i32) {
    %c0_i32 = arith.constant 0 : i32
    %c0_i32_0 = arith.constant 0 : i32
    %c0_i32_1 = arith.constant 0 : i32
    return %c0_i32, %c0_i32_0 : i32, i32
  }
  func.func @transform_4(%arg0: i32) -> (i32, i32) {
    %c0_i32 = arith.constant 0 : i32
    %c0_i32_0 = arith.constant 0 : i32
    %c0_i32_1 = arith.constant 0 : i32
    return %c0_i32, %c0_i32_0 : i32, i32
  }
  func.func @transform_5(%arg0: i32) -> (i32, i32) {
    %c0_i32 = arith.constant 0 : i32
    %c0_i32_0 = arith.constant 0 : i32
    %c0_i32_1 = arith.constant 0 : i32
    return %c0_i32, %c0_i32_0 : i32, i32
  }
  func.func @transform_6(%arg0: i32) -> (i32, i32) {
    %c0_i32 = arith.constant 0 : i32
    %c0_i32_0 = arith.constant 0 : i32
    %c0_i32_1 = arith.constant 0 : i32
    return %c0_i32, %c0_i32_0 : i32, i32
  }
  func.func @transform_7(%arg0: i32) -> (i32, i32) {
    %c0_i32 = arith.constant 0 : i32
    %c0_i32_0 = arith.constant 0 : i32
    return %arg0, %c0_i32 : i32, i32
  }
}

</mosaic_0001>

<bundles_post_ra>
// kernel: tpu_custom_call.1
= control target key start
LH: loop header
LB: loop body
LE: loop exit
PB: predicated region body
PF: predicated region fallthrough
CT: control target
= control target key end

     0   :  { %s1270_s0 = inlined_call_operand.hbm [shape: f32[16,128], index: 0, kind: input, shape index: {}]   ;;  %s1271_s1 = inlined_call_operand.vmem [shape: f32[1,128], index: 1, kind: input, shape index: {}]   ;;  %s1272_s2 = inlined_call_operand.vmem [shape: f32[1,128], index: 2, kind: input, shape index: {}]   ;;  %s1273_s3 = inlined_call_operand.hbm [shape: f32[128,128], index: 3, kind: input, shape index: {}]   ;;  %s1274_s4 = inlined_call_operand.vmem [shape: f32[1,128], index: 4, kind: input, shape index: {}]   ;;  %s1275_s5 = inlined_call_operand.hbm [shape: f32[128,128], index: 5, kind: input, shape index: {}]   ;;  %s1276_s6 = inlined_call_operand.vmem [shape: f32[1,128], index: 6, kind: input, shape index: {}]   ;;  %s1277_s7 = inlined_call_operand.hbm [shape: f32[16,128], index: 7, kind: output, shape index: {}]  }
   0x1   :  { %1282 = sst [smem:[#allocation12_spill]] %s1273_s3 }
   0x2   :  { %1283 = sst [smem:[#allocation13_spill]] %s1275_s5 }
   0x3   :  { %12 = vsyncpa [#allocation3], 0 }
   0x4   :  { %14 = vsyncpa [#allocation3 + $0x1], 0 }
   0x5   :  { %15 = vsyncpa [#allocation6], 0 }
   0x6   :  { %16 = vsyncpa [#allocation4], 0 }
   0x7   :  { %18 = vsyncpa [#allocation4 + $0x1], 0  ;;  %s1049_s24 = smov 0   ;;  %s1051_s25 = smov 0  }
   0x8   :  { %s1053_s26 = smov 0   ;;  %s1055_s27 = smov 0  }
   0x9 LB: > { %s1070_s28 = sadd.s32 4294967295, %s999_s27   ;;  %s652_s29 = sadd.s32 4294967294, %s999_s27   ;;  %s999_s27 = sphi %s1055_s27, %s1303_s27   ;;  %s995_s26 = sphi %s1053_s26, %s1302_s26   ;;  %s991_s25 = sphi %s1051_s25, %s1301_s25   ;;  %s987_s24 = sphi %s1049_s24, %s1300_s24  }
   0xa   : > { %p44_p0 = scmp.ne.s32.totalorder %s991_s25, %s987_s24  ;;  %p1278_p1 = scmp.eq.s32.totalorder %s1070_s28, 0 }
   0xb   : > { %p200_p3 = scmp.eq.s32.totalorder %s652_s29, 1  ;;  %p653_p5 = scmp.ge.s32.totalorder %s999_s27, 1 }
   0xc   : > { %p1079_p4 = por %p1278_p1, %p44_p0  ;;  %p207_p7 = scmp.lt.s32.totalorder %s999_s27, 3 }
   0xd   : > { %p1084_p6 = por %p200_p3, %p44_p0  ;;  %s1001_s10 = smov [#allocation5]  }
   0xe   : > { %s1284_s30 = scalar_select %p1079_p4, 1, 0 }
   0xf   : > { %s1285_s8 = scalar_select %p1084_p6, 1, 0 }
  0x10   : > { %p1089_p8 = pnand %p653_p5, %p207_p7  ;;  %s225_s11 = sshll.u32 %s1001_s10, 4  ;;  %s226_s11 = int_to_ptr.vmem [resolvable:$true] %s225_s11 }
  0x11   : > { %s1002_s13 = smov [#allocation7]   ;;  %s862_s15 = scalar_lea.vmem %s226_s11, 2048 }
  0x12   : > { %s1286_s9 = scalar_select %p1089_p8, 1, 0 }
  0x13   : > { %p788_p9 = pneg %p1089_p8  ;;  %s241_s14 = sshll.u32 %s1002_s13, 4  ;;  %s242_s14 = int_to_ptr.vmem [resolvable:$true] %s241_s14 }
  0x14   : > { %p863_p13 = scmp.ne.s32.totalorder %s226_s11, %s862_s15  ;;  %p870_p5 = scmp.lt.s32.totalorder %s226_s11, %s226_s11 }
  0x15   : > { %p1098_p11 = pnand %p788_p9, %p1278_p1  ;;  %p871_p7 = scmp.lt.s32.totalorder %s862_s15, %s862_s15 }
  0x17   : > { %p853_p12 = pneg %p1098_p11  ;;  %p872_p10 = por %p871_p7, %p870_p5 }
  0x19   : > { %p865_p0 = pnand %p863_p13, %p853_p12 }
  0x1b   : > { %p866_p3 = pneg %p865_p0 }
  0x1d   : > { %p873_p9 = pnand %p872_p10, %p866_p3 }
  0x1f   : > { %876 = shalt.err (!%p873_p9)
}
  0x20   : > { %s1003_s16 = smov 128   ;;  %s1004_s17 = smov 8  }
  0x21   : > { %s1288_s3 = sld [smem:[#allocation12_spill]]  ;;  %s888_s20 = scalar_lea.vmem %s242_s14, 2048 }
  0x22   : > { %p889_p1 = scmp.ne.s32.totalorder %s242_s14, %s888_s20  ;;  %p896_p2 = scmp.lt.s32.totalorder %s242_s14, %s242_s14 }
  0x23   : > { %p897_p6 = scmp.lt.s32.totalorder %s888_s20, %s888_s20 }
  0x24   : > { %p891_p13 = pnand %p889_p1, %p853_p12 }
  0x25   : > { %p898_p5 = por %p897_p6, %p896_p2 }
  0x26   : > { %p892_p0 = pneg %p891_p13 }
  0x27   : > { %791 = dma.hbm_to_vmem [thread:$0]  (!%p1098_p11), %s1288_s3, 2048, %s226_s11, [#allocation6], %s1003_s16, %s1003_s16, %s1004_s17  }
  0x28   : > { %p899_p10 = pnand %p898_p5, %p892_p0 }
  0x2a   : > { %902 = shalt.err (!%p899_p10)
}
  0x2b   : > { %s1289_s5 = sld [smem:[#allocation13_spill]]  ;;  %s1121_s23 = sadd.s32 1, %s999_s27  }
  0x2c   : > { %s31_s29 = sadd.s32 1, %s995_s26  ;;  %s28_s10 = ssub.s32 %s999_s27, %s1121_s23 }
  0x2d   : > { %p38_p1 = scmp.ne.s32.totalorder %s995_s26, %s991_s25  ;;  %p29_p2 = scmp.eq.s32.totalorder %s28_s10, 0 }
  0x2e   : > { %p39_p6 = scmp.eq.s32.totalorder %s999_s27, 0  ;;  %p1290_p12 = scmp.eq.s32.totalorder %s1070_s28, 1 }
  0x2f   : > { %p805_p7 = scmp.lt.s32.totalorder %s999_s27, 2  ;;  %s258_s13 = sand.u32 1, %s995_s26  }
  0x30   : > { %p1131_p3 = por %p1290_p12, %p38_p1  ;;  %p40_p9 = por %p39_p6, %p38_p1 }
  0x31   : > { %794 = dma.hbm_to_vmem [thread:$0]  (!%p1098_p11), %s1289_s5, 2048, %s242_s14, [#allocation6], %s1003_s16, %s1003_s16, %s1004_s17  }
  0x32   : > { %s1291_s11 = scalar_select %p1131_p3, 1, 0 }
  0x33   : > { %s1137_s12 = scalar_select %p29_p2, %s995_s26, %s31_s29  }
  0x34   : > { %s657_s15 = sshll.u32 %s258_s13, 3  ;;  %s658_s14 = sshll.u32 %s999_s27, 7 }
  0x35   : > { %s1144_s18 = scalar_lea.hbm %s1270_s0, %s658_s14  ;;  %s262_s19 = scalar_lea.vmem [#allocation2], %s657_s15 }
  0x36   : > { %s269_s20 = sshll.u32 %s262_s19, 4  ;;  %p1146_p11 = pnand %p805_p7, %p40_p9  ;;  %s270_s20 = int_to_ptr.vmem [resolvable:$true] %s269_s20 }
  0x37   : > { %s259_s22 = scalar_lea.sflag [#allocation3], %s258_s13  ;;  %s903_s29 = scalar_lea.hbm %s1144_s18, 128 }
  0x38   : > { %p904_p13 = scmp.ne.s32.totalorder %s1144_s18, %s903_s29  ;;  %p905_p0 = pneg %p1146_p11 }
  0x39   : > { %s908_s16 = scalar_lea.hbm %s1270_s0, 256  ;;  %p909_p1 = scmp.lt.s32.totalorder %s1144_s18, %s1270_s0 }
  0x3a   : > { %p906_p5 = pnand %p905_p0, %p904_p13  ;;  %p910_p2 = scmp.lt.s32.totalorder %s908_s16, %s903_s29 }
  0x3c   : > { %p907_p10 = pneg %p906_p5  ;;  %p911_p6 = por %p910_p2, %p909_p1 }
  0x3e   : > { %p912_p12 = pnand %p911_p6, %p907_p10 }
  0x40   : > { %915 = shalt.err (!%p912_p12)
}
  0x41   : > { %s916_s19 = scalar_lea.vmem %s270_s20, 128  ;;  %s1005_s13 = smov [#allocation2]  }
  0x42   : > { %p917_p7 = scmp.ne.s32.totalorder %s270_s20, %s916_s19  ;;  %s921_s3 = sshll.u32 %s1005_s13, 4  ;;  %s922_s3 = int_to_ptr.vmem [resolvable:$false] %s921_s3 }
  0x43   : > { %s923_s5 = scalar_lea.vmem %s922_s3, 256  ;;  %p924_p13 = scmp.lt.s32.totalorder %s270_s20, %s922_s3 }
  0x44   : > { %p919_p9 = pnand %p917_p7, %p905_p0  ;;  %p925_p5 = scmp.lt.s32.totalorder %s923_s5, %s916_s19 }
  0x46   : > { %p920_p3 = pneg %p919_p9  ;;  %p926_p4 = por %p925_p5, %p924_p13 }
  0x48   : > { %p927_p8 = pnand %p926_p4, %p920_p3 }
  0x4a   : > { %930 = shalt.err (!%p927_p8)
}
  0x4b   : > { %798 = dma.hbm_to_vmem [thread:$0]  (!%p1146_p11), %s1144_s18, 128, %s270_s20, %s259_s22  }
  0x4c   : > { %p1293_p10 = scmp.ne.s32.totalorder %s1286_s9, 0 }
  0x4d   : > { %s1167_s29 = sand.u32 (!%p1293_p10), 1, %s991_s25   ;;  %p1294_p4 = scmp.ne.s32.totalorder (!%p1293_p10), %s1284_s30, 0 }
  0x4e   : > { %278 = sbr.rel (%p1293_p10) target bundleno = 818 (0x332), region = 48  ;;  %s660_s10 = sshll.u32 (!%p1293_p10), %s1167_s29, 3 }
  0x4f   : > { %s281_s3 = scalar_lea.sflag (!%p1293_p10), [#allocation3], %s1167_s29  ;;  %s284_s5 = scalar_lea.vmem (!%p1293_p10), [#allocation2], %s660_s10 }
  0x53   : > { %974 = dma.done.wait (%p1294_p4), %s281_s3, 128  }
  0x54   : > { %976 = vsyncadd (%p1294_p4), %s281_s3, 4294967168  ;;  %p1295_p8 = scmp.eq.s32.totalorder %s1070_s28, 0 }
  0x56   : > { %978 = dma.done.wait (%p1295_p8), [#allocation6], 4096   ;;  %p1296_p3 = pmov %p1295_p8 }
  0x57   : > { %v323_v0 = vld [vmem:[%s284_s5] sm:$0xff]  ;;  %v1006_v2 = vmov 0.0   ;;  %v370_v4 = vld [vmem:[#allocation5 + $0x68] sm:$0xff]  ;;  %v369_v5 = vld [vmem:[#allocation5 + $0x60] sm:$0xff]  ;;  %v328_v6 = vlaneseq  ;;  %vm1007_vm1 = vmmov 0   ;;  %s669_s17 = sshll.u32 %s1070_s28, 7 }
  0x58   : > { %980 = vsyncadd (%p1296_p3), [#allocation6], 4294963200  ;;  %324 = vadd.xlane.f32.xlu0 %v323_v0  ;;  %v372_v1 = vld [vmem:[#allocation5 + $0x78] sm:$0xff]  ;;  %706 = vmatprep.subr.mxu0 %v1006_v2  ;;  %v371_v3 = vld [vmem:[#allocation5 + $0x70] sm:$0xff]  ;;  %s322_s15 = scalar_lea.vmem [#allocation8], %s660_s10  ;;  %s1233_s5 = scalar_lea.hbm %s1277_s7, %s669_s17 }
  0x59   : > { %741 = vmatprep.subr.mxu1 %v1006_v2  ;;  %707 = vmatpush3.msra.mxu0 %v372_v1  ;;  %v329_v7 = vand.u32 127, %v328_v6  ;;  %v368_v13 = vld [vmem:[#allocation5 + $0x58] sm:$0xff]  ;;  %v367_v14 = vld [vmem:[#allocation5 + $0x50] sm:$0xff]  ;;  %v366_v15 = vld [vmem:[#allocation5 + $0x48] sm:$0xff]  ;;  %s563_s19 = sshll.u32 %s322_s15, 4  ;;  %s550_s30 = scalar_lea.sflag [#allocation4], %s1167_s29  ;;  %s564_s19 = int_to_ptr.vmem [resolvable:$true] %s563_s19 }
  0x5a   : > { %708 = vmatprep.subr.mxu0 %v1006_v2  ;;  %v365_v16 = vld [vmem:[#allocation5 + $0x40] sm:$0xff]  ;;  %738 = vmatprep.mubr.msk.f32.mxu0 %vm1007_vm1, %v1006_v2  ;;  %v364_v17 = vld [vmem:[#allocation5 + $0x38] sm:$0xff]  ;;  %v363_v18 = vld [vmem:[#allocation5 + $0x30] sm:$0xff]  ;;  %s931_s9 = scalar_lea.vmem %s564_s19, 128  ;;  %p1297_p0 = scmp.ne.s32.totalorder %s1291_s11, 0 }
  0x5b   : > { %709 = vmatpush3.msra.mxu0 %v371_v3  ;;  %vm330_vm0 = vcmp.lt.s32.totalorder %v329_v7, 32  ;;  %773 = vmatprep.mubr.msk.f32.mxu1 %vm1007_vm1, %v1006_v2  ;;  %v362_v19 = vld [vmem:[#allocation5 + $0x28] sm:$0xff]  ;;  %v361_v20 = vld [vmem:[#allocation5 + $0x20] sm:$0xff]  ;;  %v360_v21 = vld [vmem:[#allocation5 + $0x18] sm:$0xff]  ;;  %p932_p11 = scmp.ne.s32.totalorder %s564_s19, %s931_s9  ;;  %s1008_s28 = smov [#allocation8]  }
  0x5c   : > { %710 = vmatprep.subr.mxu0 %v1006_v2  ;;  %v359_v22 = vld [vmem:[#allocation5 + $0x10] sm:$0xff]  ;;  %v358_v23 = vld [vmem:[#allocation5 + $0x8] sm:$0xff]  ;;  %v357_v24 = vld [vmem:[#allocation5] sm:$0xff]  ;;  %s935_s18 = sshll.u32 %s1008_s28, 4  ;;  %s936_s18 = int_to_ptr.vmem [resolvable:$false] %s935_s18 }
  0x5d   : > { %711 = vmatpush3.msra.mxu0 %v370_v4  ;;  %v470_v25 = vld [vmem:[#allocation7 + $0x78] sm:$0xff]  ;;  %v469_v26 = vld [vmem:[#allocation7 + $0x70] sm:$0xff]  ;;  %v468_v27 = vld [vmem:[#allocation7 + $0x68] sm:$0xff]  ;;  %p933_p1 = pnand %p932_p11, %p1297_p0  ;;  %s937_s10 = scalar_lea.vmem %s936_s18, 256 }
  0x5e   : > { %712 = vmatprep.subr.mxu0 %v1006_v2  ;;  %742 = vmatpush3.msra.mxu1 %v470_v25  ;;  %v467_v28 = vld [vmem:[#allocation7 + $0x60] sm:$0xff]  ;;  %v664_v33 = vld [vmem:[%s1271_s1] ss:$0 sm:$0xff]  ;;  %v466_v38 = vld [vmem:[#allocation7 + $0x58] sm:$0xff]  ;;  %p938_p6 = scmp.lt.s32.totalorder %s564_s19, %s936_s18  ;;  %p939_p12 = scmp.lt.s32.totalorder %s937_s10, %s931_s9 }
  0x5f   : > { %713 = vmatpush3.msra.mxu0 %v369_v5  ;;  %743 = vmatprep.subr.mxu1 %v1006_v2  ;;  %v665_v35 = vld [vmem:[%s1272_s2] ss:$0 sm:$0xff]  ;;  %v464_v40 = vld [vmem:[#allocation7 + $0x48] sm:$0xff]  ;;  %v463_v41 = vld [vmem:[#allocation7 + $0x40] sm:$0xff]  ;;  %p934_p2 = pneg %p933_p1 }
  0x60   : > { %714 = vmatprep.subr.mxu0 %v1006_v2  ;;  %744 = vmatpush3.msra.mxu1 %v469_v26  ;;  %v465_v39 = vld [vmem:[#allocation7 + $0x50] sm:$0xff]  ;;  %v462_v42 = vld [vmem:[#allocation7 + $0x38] sm:$0xff]  ;;  %v460_v44 = vld [vmem:[#allocation7 + $0x28] sm:$0xff]  ;;  %p940_p7 = por %p939_p12, %p938_p6 }
  0x61   : > { %715 = vmatpush3.msra.mxu0 %v368_v13  ;;  %745 = vmatprep.subr.mxu1 %v1006_v2  ;;  %v461_v43 = vld [vmem:[#allocation7 + $0x30] sm:$0xff]  ;;  %v459_v45 = vld [vmem:[#allocation7 + $0x20] sm:$0xff]  ;;  %v458_v46 = vld [vmem:[#allocation7 + $0x18] sm:$0xff] }
  0x62   : > { %716 = vmatprep.subr.mxu0 %v1006_v2  ;;  %746 = vmatpush3.msra.mxu1 %v468_v27  ;;  %v457_v47 = vld [vmem:[#allocation7 + $0x10] sm:$0xff]  ;;  %v456_v48 = vld [vmem:[#allocation7 + $0x8] sm:$0xff]  ;;  %v455_v49 = vld [vmem:[#allocation7] sm:$0xff]  ;;  %p941_p9 = pnand %p940_p7, %p934_p2 }
  0x63   : > { %717 = vmatpush3.msra.mxu0 %v367_v14  ;;  %747 = vmatprep.subr.mxu1 %v1006_v2  ;;  %v666_v50 = vld [vmem:[%s1274_s4] ss:$0 sm:$0xff] }
  0x64   : > { %718 = vmatprep.subr.mxu0 %v1006_v2  ;;  %748 = vmatpush3.msra.mxu1 %v467_v28  ;;  %v667_v59 = vld [vmem:[%s1276_s6] ss:$0 sm:$0xff] }
  0x65   : > { %719 = vmatpush3.msra.mxu0 %v366_v15  ;;  %749 = vmatprep.subr.mxu1 %v1006_v2 }
  0x66   : > { %720 = vmatprep.subr.mxu0 %v1006_v2  ;;  %750 = vmatpush3.msra.mxu1 %v466_v38 }
  0x67   : > { %721 = vmatpush3.msra.mxu0 %v365_v16  ;;  %751 = vmatprep.subr.mxu1 %v1006_v2 }
  0x68   : > { %722 = vmatprep.subr.mxu0 %v1006_v2  ;;  %752 = vmatpush3.msra.mxu1 %v465_v39 }
  0x69   : > { %723 = vmatpush3.msra.mxu0 %v364_v17  ;;  %753 = vmatprep.subr.mxu1 %v1006_v2 }
  0x6a   : > { %724 = vmatprep.subr.mxu0 %v1006_v2  ;;  %754 = vmatpush3.msra.mxu1 %v464_v40 }
  0x6b   : > { %725 = vmatpush3.msra.mxu0 %v363_v18  ;;  %755 = vmatprep.subr.mxu1 %v1006_v2 }
  0x6c   : > { %726 = vmatprep.subr.mxu0 %v1006_v2  ;;  %756 = vmatpush3.msra.mxu1 %v463_v41 }
  0x6d   : > { %727 = vmatpush3.msra.mxu0 %v362_v19  ;;  %757 = vmatprep.subr.mxu1 %v1006_v2 }
  0x6e   : > { %728 = vmatprep.subr.mxu0 %v1006_v2  ;;  %758 = vmatpush3.msra.mxu1 %v462_v42 }
  0x6f   : > { %729 = vmatpush3.msra.mxu0 %v361_v20  ;;  %759 = vmatprep.subr.mxu1 %v1006_v2 }
  0x70   : > { %730 = vmatprep.subr.mxu0 %v1006_v2  ;;  %760 = vmatpush3.msra.mxu1 %v461_v43 }
  0x71   : > { %731 = vmatpush3.msra.mxu0 %v360_v21  ;;  %761 = vmatprep.subr.mxu1 %v1006_v2 }
  0x72   : > { %732 = vmatprep.subr.mxu0 %v1006_v2  ;;  %762 = vmatpush3.msra.mxu1 %v460_v44 }
  0x73   : > { %733 = vmatpush3.msra.mxu0 %v359_v22  ;;  %763 = vmatprep.subr.mxu1 %v1006_v2 }
  0x74   : > { %734 = vmatprep.subr.mxu0 %v1006_v2  ;;  %764 = vmatpush3.msra.mxu1 %v459_v45 }
  0x75   : > { %735 = vmatpush3.msra.mxu0 %v358_v23  ;;  %765 = vmatprep.subr.mxu1 %v1006_v2 }
  0x76   : > { %736 = vmatprep.subr.mxu0 %v1006_v2  ;;  %766 = vmatpush3.msra.mxu1 %v458_v46 }
  0x77   : > { %737 = vmatpush3.msra.mxu0 %v357_v24  ;;  %767 = vmatprep.subr.mxu1 %v1006_v2 }
  0x78   : > { %768 = vmatpush3.msra.mxu1 %v457_v47 }
  0x79   : > { %769 = vmatprep.subr.mxu1 %v1006_v2 }
  0x7a   : > { %770 = vmatpush3.msra.mxu1 %v456_v48 }
  0x7b   : > { %771 = vmatprep.subr.mxu1 %v1006_v2 }
  0x7c   : > { %772 = vmatpush3.msra.mxu1 %v455_v49 }
  0xe1   : > { %v325_v8 = vpop.xlane.xlu0 %324 }
  0xe2   : > { %v326_v9 = vmul.f32 0.03125, %v325_v8 }
  0xe4   : > { %v327_v10 = vsub.f32 %v323_v0, %v326_v9 }
  0xe6   : > { %v333_v11 = vsel %vm330_vm0, %v327_v10, 0.0 }
  0xe7   : > { %v334_v12 = vmul.f32 %v333_v11, %v333_v11 }
  0xe9   : > { %335 = vadd.xlane.f32.xlu0 %v334_v12 }
 0x172   : > { %v336_v29 = vpop.xlane.xlu0 %335 }
 0x173   : > { %v337_v30 = vmul.f32 0.03125, %v336_v29 }
 0x175   : > { %v338_v31 = vadd.f32 1e-05, %v337_v30 }
 0x177   : > { %847 = vrsqrt.f32 %v338_v31 }
 0x184   : > { %v848_v32 = vpop.eup %847 }
 0x185   : > { %v340_v34 = vmul.f32 %v848_v32, %v333_v11 }
 0x187   : > { %v348_v36 = vmul.f32 %v664_v33, %v340_v34 }
 0x189   : > { %v356_v37 = vadd.f32 %v665_v35, %v348_v36 }
 0x18b   : > { %739 = vmatmul.mubr.f32.vlgmr.msra.gmra.mxu0 %v356_v37 }
 0x24b   : > { %v446_v51 = vpop.f32.mrf.mxu0 }
 0x24c   : > { %v447_v52 = vadd.f32 %v666_v50, %v446_v51 }
 0x24d   : > { %v740_v53 = vpop.f32.mrf.mxu0 }
 0x24e   : > { %v451_v54 = vmul.f32 0.70710677, %v447_v52  ;;  %v450_v56 = vmul.f32 0.5, %v447_v52 }
 0x250   : > { %849 = verf.f32 %v451_v54 }
 0x25d   : > { %v850_v55 = vpop.eup %849 }
 0x25e   : > { %v453_v57 = vadd.f32 1.0, %v850_v55 }
 0x260   : > { %v454_v58 = vmul.f32 %v453_v57, %v450_v56 }
 0x262   : > { %774 = vmatmul.mubr.f32.vlgmr.msra.gmra.mxu1 %v454_v58 }
 0x322   : > { %v544_v60 = vpop.f32.mrf.mxu1 }
 0x323   : > { %v545_v61 = vadd.f32 %v667_v59, %v544_v60 }
 0x324   : > { %v775_v62 = vpop.f32.mrf.mxu1 }
 0x325   : > { %548 = vst [vmem:[%s322_s15] sm:$0xff] %v545_v61 }
 0x326   : > { %944 = shalt.err (!%p941_p9)
}
 0x327   : > { %s945_s20 = scalar_lea.hbm %s1233_s5, 128  ;;  %s949_s22 = scalar_lea.hbm %s1277_s7, 256 }
 0x328   : > { %p946_p13 = scmp.ne.s32.totalorder %s1233_s5, %s945_s20  ;;  %p950_p4 = scmp.lt.s32.totalorder %s1233_s5, %s1277_s7 }
 0x329   : > { %p951_p8 = scmp.lt.s32.totalorder %s949_s22, %s945_s20 }
 0x32a   : > { %p947_p5 = pnand %p946_p13, %p1297_p0 }
 0x32b   : > { %p952_p3 = por %p951_p8, %p950_p4 }
 0x32c   : > { %p948_p10 = pneg %p947_p5 }
 0x32e   : > { %p953_p11 = pnand %p952_p3, %p948_p10 }
 0x330   : > { %956 = shalt.err (!%p953_p11)
}
 0x331   : > { %786 = dma.vmem_to_hbm [thread:$0]  (%p1297_p0), %s564_s19, 128, %s1233_s5, %s550_s30  }
 0x332 PF: > { %s575_s17 = sand.u32 1, %s987_s24   ;;  %p1298_p1 = scmp.ne.s32.totalorder %s1285_s8, 0 }
 0x333   : > { %p1299_p2 = scmp.ge.s32.totalorder %s999_s27, 2  ;;  %s576_s15 = scalar_lea.sflag [#allocation4], %s575_s17 }
 0x335   : > { %p800_p6 = pnand %p1299_p2, %p1298_p1 }
 0x337   : > { %p801_p12 = pneg %p800_p6 }
 0x339   : > { %982 = dma.done.wait (%p801_p12), %s576_s15, 128  }
 0x33a   : > { %984 = vsyncadd (%p801_p12), %s576_s15, 4294967168  ;;  %p21_p7 = scmp.ge.s32.totalorder %s1121_s23, 4   ;;  %s1300_s24 = smov %s991_s25 }
 0x33b   : > { %s1301_s25 = smov %s995_s26  ;;  %s1302_s26 = smov %s1137_s12 }
 0x33c   : > { %s1303_s27 = smov %s1121_s23  ;;  %23 = sbr.rel (!%p21_p7) target bundleno = 9 (0x9), region = 101 }
 0x341   :  { %581 = vsyncpa [#allocation3], 1 }
 0x342   :  { %583 = vsyncpa [#allocation3 + $0x1], 1 }
 0x343   :  { %584 = vsyncpa [#allocation6], 1 }
 0x344   :  { %585 = vsyncpa [#allocation4], 1 }
 0x345   :  { %587 = vsyncpa [#allocation4 + $0x1], 1 }

// kernel: tpu_custom_call.1
= control target key start
LH: loop header
LB: loop body
LE: loop exit
PB: predicated region body
PF: predicated region fallthrough
CT: control target
= control target key end

     0   :  { %s1270_s0 = inlined_call_operand.hbm [shape: f32[16,128], index: 0, kind: input, shape index: {}]   ;;  %s1271_s1 = inlined_call_operand.vmem [shape: f32[1,128], index: 1, kind: input, shape index: {}]   ;;  %s1272_s2 = inlined_call_operand.vmem [shape: f32[1,128], index: 2, kind: input, shape index: {}]   ;;  %s1273_s3 = inlined_call_operand.hbm [shape: f32[128,128], index: 3, kind: input, shape index: {}]   ;;  %s1274_s4 = inlined_call_operand.vmem [shape: f32[1,128], index: 4, kind: input, shape index: {}]   ;;  %s1275_s5 = inlined_call_operand.hbm [shape: f32[128,128], index: 5, kind: input, shape index: {}]   ;;  %s1276_s6 = inlined_call_operand.vmem [shape: f32[1,128], index: 6, kind: input, shape index: {}]   ;;  %s1277_s7 = inlined_call_operand.hbm [shape: f32[16,128], index: 7, kind: output, shape index: {}]  }
   0x1   :  { %1282 = sst [smem:[#allocation12_spill]] %s1273_s3 }
   0x2   :  { %1283 = sst [smem:[#allocation13_spill]] %s1275_s5 }
   0x3   :  { %12 = vsyncpa [#allocation3], 0 }
   0x4   :  { %14 = vsyncpa [#allocation3 + $0x1], 0 }
   0x5   :  { %15 = vsyncpa [#allocation6], 0 }
   0x6   :  { %16 = vsyncpa [#allocation4], 0 }
   0x7   :  { %18 = vsyncpa [#allocation4 + $0x1], 0  ;;  %s1049_s24 = smov 0   ;;  %s1051_s25 = smov 0  }
   0x8   :  { %s1053_s26 = smov 0   ;;  %s1055_s27 = smov 0  }
   0x9 LB: > { %s1070_s28 = sadd.s32 4294967295, %s999_s27   ;;  %s652_s29 = sadd.s32 4294967294, %s999_s27   ;;  %s999_s27 = sphi %s1055_s27, %s1303_s27   ;;  %s995_s26 = sphi %s1053_s26, %s1302_s26   ;;  %s991_s25 = sphi %s1051_s25, %s1301_s25   ;;  %s987_s24 = sphi %s1049_s24, %s1300_s24  }
   0xa   : > { %p44_p0 = scmp.ne.s32.totalorder %s991_s25, %s987_s24  ;;  %p1278_p1 = scmp.eq.s32.totalorder %s1070_s28, 0 }
   0xb   : > { %p200_p3 = scmp.eq.s32.totalorder %s652_s29, 1  ;;  %p653_p5 = scmp.ge.s32.totalorder %s999_s27, 1 }
   0xc   : > { %p1079_p4 = por %p1278_p1, %p44_p0  ;;  %p207_p7 = scmp.lt.s32.totalorder %s999_s27, 3 }
   0xd   : > { %p1084_p6 = por %p200_p3, %p44_p0  ;;  %s1001_s10 = smov [#allocation5]  }
   0xe   : > { %s1284_s30 = scalar_select %p1079_p4, 1, 0 }
   0xf   : > { %s1285_s8 = scalar_select %p1084_p6, 1, 0 }
  0x10   : > { %p1089_p8 = pnand %p653_p5, %p207_p7  ;;  %s225_s11 = sshll.u32 %s1001_s10, 4  ;;  %s226_s11 = int_to_ptr.vmem [resolvable:$true] %s225_s11 }
  0x11   : > { %s1002_s13 = smov [#allocation7]   ;;  %s862_s15 = scalar_lea.vmem %s226_s11, 2048 }
  0x12   : > { %s1286_s9 = scalar_select %p1089_p8, 1, 0 }
  0x13   : > { %p788_p9 = pneg %p1089_p8  ;;  %s241_s14 = sshll.u32 %s1002_s13, 4  ;;  %s242_s14 = int_to_ptr.vmem [resolvable:$true] %s241_s14 }
  0x14   : > { %p863_p13 = scmp.ne.s32.totalorder %s226_s11, %s862_s15  ;;  %p870_p5 = scmp.lt.s32.totalorder %s226_s11, %s226_s11 }
  0x15   : > { %p1098_p11 = pnand %p788_p9, %p1278_p1  ;;  %p871_p7 = scmp.lt.s32.totalorder %s862_s15, %s862_s15 }
  0x17   : > { %p853_p12 = pneg %p1098_p11  ;;  %p872_p10 = por %p871_p7, %p870_p5 }
  0x19   : > { %p865_p0 = pnand %p863_p13, %p853_p12 }
  0x1b   : > { %p866_p3 = pneg %p865_p0 }
  0x1d   : > { %p873_p9 = pnand %p872_p10, %p866_p3 }
  0x1f   : > { %876 = shalt.err (!%p873_p9)
}
  0x20   : > { %s1003_s16 = smov 128   ;;  %s1004_s17 = smov 8  }
  0x21   : > { %s1288_s3 = sld [smem:[#allocation12_spill]]  ;;  %s888_s20 = scalar_lea.vmem %s242_s14, 2048 }
  0x22   : > { %p889_p1 = scmp.ne.s32.totalorder %s242_s14, %s888_s20  ;;  %p896_p2 = scmp.lt.s32.totalorder %s242_s14, %s242_s14 }
  0x23   : > { %p897_p6 = scmp.lt.s32.totalorder %s888_s20, %s888_s20 }
  0x24   : > { %p891_p13 = pnand %p889_p1, %p853_p12 }
  0x25   : > { %p898_p5 = por %p897_p6, %p896_p2 }
  0x26   : > { %p892_p0 = pneg %p891_p13 }
  0x27   : > { %791 = dma.hbm_to_vmem [thread:$0]  (!%p1098_p11), %s1288_s3, 2048, %s226_s11, [#allocation6], %s1003_s16, %s1003_s16, %s1004_s17  }
  0x28   : > { %p899_p10 = pnand %p898_p5, %p892_p0 }
  0x2a   : > { %902 = shalt.err (!%p899_p10)
}
  0x2b   : > { %s1289_s5 = sld [smem:[#allocation13_spill]]  ;;  %s1121_s23 = sadd.s32 1, %s999_s27  }
  0x2c   : > { %s31_s29 = sadd.s32 1, %s995_s26  ;;  %s28_s10 = ssub.s32 %s999_s27, %s1121_s23 }
  0x2d   : > { %p38_p1 = scmp.ne.s32.totalorder %s995_s26, %s991_s25  ;;  %p29_p2 = scmp.eq.s32.totalorder %s28_s10, 0 }
  0x2e   : > { %p39_p6 = scmp.eq.s32.totalorder %s999_s27, 0  ;;  %p1290_p12 = scmp.eq.s32.totalorder %s1070_s28, 1 }
  0x2f   : > { %p805_p7 = scmp.lt.s32.totalorder %s999_s27, 2  ;;  %s258_s13 = sand.u32 1, %s995_s26  }
  0x30   : > { %p1131_p3 = por %p1290_p12, %p38_p1  ;;  %p40_p9 = por %p39_p6, %p38_p1 }
  0x31   : > { %794 = dma.hbm_to_vmem [thread:$0]  (!%p1098_p11), %s1289_s5, 2048, %s242_s14, [#allocation6], %s1003_s16, %s1003_s16, %s1004_s17  }
  0x32   : > { %s1291_s11 = scalar_select %p1131_p3, 1, 0 }
  0x33   : > { %s1137_s12 = scalar_select %p29_p2, %s995_s26, %s31_s29  }
  0x34   : > { %s657_s15 = sshll.u32 %s258_s13, 3  ;;  %s658_s14 = sshll.u32 %s999_s27, 7 }
  0x35   : > { %s1144_s18 = scalar_lea.hbm %s1270_s0, %s658_s14  ;;  %s262_s19 = scalar_lea.vmem [#allocation2], %s657_s15 }
  0x36   : > { %s269_s20 = sshll.u32 %s262_s19, 4  ;;  %p1146_p11 = pnand %p805_p7, %p40_p9  ;;  %s270_s20 = int_to_ptr.vmem [resolvable:$true] %s269_s20 }
  0x37   : > { %s259_s22 = scalar_lea.sflag [#allocation3], %s258_s13  ;;  %s903_s29 = scalar_lea.hbm %s1144_s18, 128 }
  0x38   : > { %p904_p13 = scmp.ne.s32.totalorder %s1144_s18, %s903_s29  ;;  %p905_p0 = pneg %p1146_p11 }
  0x39   : > { %s908_s16 = scalar_lea.hbm %s1270_s0, 256  ;;  %p909_p1 = scmp.lt.s32.totalorder %s1144_s18, %s1270_s0 }
  0x3a   : > { %p906_p5 = pnand %p905_p0, %p904_p13  ;;  %p910_p2 = scmp.lt.s32.totalorder %s908_s16, %s903_s29 }
  0x3c   : > { %p907_p10 = pneg %p906_p5  ;;  %p911_p6 = por %p910_p2, %p909_p1 }
  0x3e   : > { %p912_p12 = pnand %p911_p6, %p907_p10 }
  0x40   : > { %915 = shalt.err (!%p912_p12)
}
  0x41   : > { %s916_s19 = scalar_lea.vmem %s270_s20, 128  ;;  %s1005_s13 = smov [#allocation2]  }
  0x42   : > { %p917_p7 = scmp.ne.s32.totalorder %s270_s20, %s916_s19  ;;  %s921_s3 = sshll.u32 %s1005_s13, 4  ;;  %s922_s3 = int_to_ptr.vmem [resolvable:$false] %s921_s3 }
  0x43   : > { %s923_s5 = scalar_lea.vmem %s922_s3, 256  ;;  %p924_p13 = scmp.lt.s32.totalorder %s270_s20, %s922_s3 }
  0x44   : > { %p919_p9 = pnand %p917_p7, %p905_p0  ;;  %p925_p5 = scmp.lt.s32.totalorder %s923_s5, %s916_s19 }
  0x46   : > { %p920_p3 = pneg %p919_p9  ;;  %p926_p4 = por %p925_p5, %p924_p13 }
  0x48   : > { %p927_p8 = pnand %p926_p4, %p920_p3 }
  0x4a   : > { %930 = shalt.err (!%p927_p8)
}
  0x4b   : > { %798 = dma.hbm_to_vmem [thread:$0]  (!%p1146_p11), %s1144_s18, 128, %s270_s20, %s259_s22  }
  0x4c   : > { %p1293_p10 = scmp.ne.s32.totalorder %s1286_s9, 0 }
  0x4d   : > { %s1167_s29 = sand.u32 (!%p1293_p10), 1, %s991_s25   ;;  %p1294_p4 = scmp.ne.s32.totalorder (!%p1293_p10), %s1284_s30, 0 }
  0x4e   : > { %278 = sbr.rel (%p1293_p10) target bundleno = 818 (0x332), region = 48  ;;  %s660_s10 = sshll.u32 (!%p1293_p10), %s1167_s29, 3 }
  0x4f   : > { %s281_s3 = scalar_lea.sflag (!%p1293_p10), [#allocation3], %s1167_s29  ;;  %s284_s5 = scalar_lea.vmem (!%p1293_p10), [#allocation2], %s660_s10 }
  0x53   : > { %974 = dma.done.wait (%p1294_p4), %s281_s3, 128  }
  0x54   : > { %976 = vsyncadd (%p1294_p4), %s281_s3, 4294967168  ;;  %p1295_p8 = scmp.eq.s32.totalorder %s1070_s28, 0 }
  0x56   : > { %978 = dma.done.wait (%p1295_p8), [#allocation6], 4096   ;;  %p1296_p3 = pmov %p1295_p8 }
  0x57   : > { %v323_v0 = vld [vmem:[%s284_s5] sm:$0xff]  ;;  %v1006_v2 = vmov 0.0   ;;  %v370_v4 = vld [vmem:[#allocation5 + $0x68] sm:$0xff]  ;;  %v369_v5 = vld [vmem:[#allocation5 + $0x60] sm:$0xff]  ;;  %v328_v6 = vlaneseq  ;;  %vm1007_vm1 = vmmov 0   ;;  %s669_s17 = sshll.u32 %s1070_s28, 7 }
  0x58   : > { %980 = vsyncadd (%p1296_p3), [#allocation6], 4294963200  ;;  %324 = vadd.xlane.f32.xlu0 %v323_v0  ;;  %v372_v1 = vld [vmem:[#allocation5 + $0x78] sm:$0xff]  ;;  %706 = vmatprep.subr.mxu0 %v1006_v2  ;;  %v371_v3 = vld [vmem:[#allocation5 + $0x70] sm:$0xff]  ;;  %s322_s15 = scalar_lea.vmem [#allocation8], %s660_s10  ;;  %s1233_s5 = scalar_lea.hbm %s1277_s7, %s669_s17 }
  0x59   : > { %741 = vmatprep.subr.mxu1 %v1006_v2  ;;  %707 = vmatpush3.msra.mxu0 %v372_v1  ;;  %v329_v7 = vand.u32 127, %v328_v6  ;;  %v368_v13 = vld [vmem:[#allocation5 + $0x58] sm:$0xff]  ;;  %v367_v14 = vld [vmem:[#allocation5 + $0x50] sm:$0xff]  ;;  %v366_v15 = vld [vmem:[#allocation5 + $0x48] sm:$0xff]  ;;  %s563_s19 = sshll.u32 %s322_s15, 4  ;;  %s550_s30 = scalar_lea.sflag [#allocation4], %s1167_s29  ;;  %s564_s19 = int_to_ptr.vmem [resolvable:$true] %s563_s19 }
  0x5a   : > { %708 = vmatprep.subr.mxu0 %v1006_v2  ;;  %v365_v16 = vld [vmem:[#allocation5 + $0x40] sm:$0xff]  ;;  %738 = vmatprep.mubr.msk.f32.mxu0 %vm1007_vm1, %v1006_v2  ;;  %v364_v17 = vld [vmem:[#allocation5 + $0x38] sm:$0xff]  ;;  %v363_v18 = vld [vmem:[#allocation5 + $0x30] sm:$0xff]  ;;  %s931_s9 = scalar_lea.vmem %s564_s19, 128  ;;  %p1297_p0 = scmp.ne.s32.totalorder %s1291_s11, 0 }
  0x5b   : > { %709 = vmatpush3.msra.mxu0 %v371_v3  ;;  %vm330_vm0 = vcmp.lt.s32.totalorder %v329_v7, 32  ;;  %773 = vmatprep.mubr.msk.f32.mxu1 %vm1007_vm1, %v1006_v2  ;;  %v362_v19 = vld [vmem:[#allocation5 + $0x28] sm:$0xff]  ;;  %v361_v20 = vld [vmem:[#allocation5 + $0x20] sm:$0xff]  ;;  %v360_v21 = vld [vmem:[#allocation5 + $0x18] sm:$0xff]  ;;  %p932_p11 = scmp.ne.s32.totalorder %s564_s19, %s931_s9  ;;  %s1008_s28 = smov [#allocation8]  }
  0x5c   : > { %710 = vmatprep.subr.mxu0 %v1006_v2  ;;  %v359_v22 = vld [vmem:[#allocation5 + $0x10] sm:$0xff]  ;;  %v358_v23 = vld [vmem:[#allocation5 + $0x8] sm:$0xff]  ;;  %v357_v24 = vld [vmem:[#allocation5] sm:$0xff]  ;;  %s935_s18 = sshll.u32 %s1008_s28, 4  ;;  %s936_s18 = int_to_ptr.vmem [resolvable:$false] %s935_s18 }
  0x5d   : > { %711 = vmatpush3.msra.mxu0 %v370_v4  ;;  %v470_v25 = vld [vmem:[#allocation7 + $0x78] sm:$0xff]  ;;  %v469_v26 = vld [vmem:[#allocation7 + $0x70] sm:$0xff]  ;;  %v468_v27 = vld [vmem:[#allocation7 + $0x68] sm:$0xff]  ;;  %p933_p1 = pnand %p932_p11, %p1297_p0  ;;  %s937_s10 = scalar_lea.vmem %s936_s18, 256 }
  0x5e   : > { %712 = vmatprep.subr.mxu0 %v1006_v2  ;;  %742 = vmatpush3.msra.mxu1 %v470_v25  ;;  %v467_v28 = vld [vmem:[#allocation7 + $0x60] sm:$0xff]  ;;  %v664_v33 = vld [vmem:[%s1271_s1] ss:$0 sm:$0xff]  ;;  %v466_v38 = vld [vmem:[#allocation7 + $0x58] sm:$0xff]  ;;  %p938_p6 = scmp.lt.s32.totalorder %s564_s19, %s936_s18  ;;  %p939_p12 = scmp.lt.s32.totalorder %s937_s10, %s931_s9 }
  0x5f   : > { %713 = vmatpush3.msra.mxu0 %v369_v5  ;;  %743 = vmatprep.subr.mxu1 %v1006_v2  ;;  %v665_v35 = vld [vmem:[%s1272_s2] ss:$0 sm:$0xff]  ;;  %v464_v40 = vld [vmem:[#allocation7 + $0x48] sm:$0xff]  ;;  %v463_v41 = vld [vmem:[#allocation7 + $0x40] sm:$0xff]  ;;  %p934_p2 = pneg %p933_p1 }
  0x60   : > { %714 = vmatprep.subr.mxu0 %v1006_v2  ;;  %744 = vmatpush3.msra.mxu1 %v469_v26  ;;  %v465_v39 = vld [vmem:[#allocation7 + $0x50] sm:$0xff]  ;;  %v462_v42 = vld [vmem:[#allocation7 + $0x38] sm:$0xff]  ;;  %v460_v44 = vld [vmem:[#allocation7 + $0x28] sm:$0xff]  ;;  %p940_p7 = por %p939_p12, %p938_p6 }
  0x61   : > { %715 = vmatpush3.msra.mxu0 %v368_v13  ;;  %745 = vmatprep.subr.mxu1 %v1006_v2  ;;  %v461_v43 = vld [vmem:[#allocation7 + $0x30] sm:$0xff]  ;;  %v459_v45 = vld [vmem:[#allocation7 + $0x20] sm:$0xff]  ;;  %v458_v46 = vld [vmem:[#allocation7 + $0x18] sm:$0xff] }
  0x62   : > { %716 = vmatprep.subr.mxu0 %v1006_v2  ;;  %746 = vmatpush3.msra.mxu1 %v468_v27  ;;  %v457_v47 = vld [vmem:[#allocation7 + $0x10] sm:$0xff]  ;;  %v456_v48 = vld [vmem:[#allocation7 + $0x8] sm:$0xff]  ;;  %v455_v49 = vld [vmem:[#allocation7] sm:$0xff]  ;;  %p941_p9 = pnand %p940_p7, %p934_p2 }
  0x63   : > { %717 = vmatpush3.msra.mxu0 %v367_v14  ;;  %747 = vmatprep.subr.mxu1 %v1006_v2  ;;  %v666_v50 = vld [vmem:[%s1274_s4] ss:$0 sm:$0xff] }
  0x64   : > { %718 = vmatprep.subr.mxu0 %v1006_v2  ;;  %748 = vmatpush3.msra.mxu1 %v467_v28  ;;  %v667_v59 = vld [vmem:[%s1276_s6] ss:$0 sm:$0xff] }
  0x65   : > { %719 = vmatpush3.msra.mxu0 %v366_v15  ;;  %749 = vmatprep.subr.mxu1 %v1006_v2 }
  0x66   : > { %720 = vmatprep.subr.mxu0 %v1006_v2  ;;  %750 = vmatpush3.msra.mxu1 %v466_v38 }
  0x67   : > { %721 = vmatpush3.msra.mxu0 %v365_v16  ;;  %751 = vmatprep.subr.mxu1 %v1006_v2 }
  0x68   : > { %722 = vmatprep.subr.mxu0 %v1006_v2  ;;  %752 = vmatpush3.msra.mxu1 %v465_v39 }
  0x69   : > { %723 = vmatpush3.msra.mxu0 %v364_v17  ;;  %753 = vmatprep.subr.mxu1 %v1006_v2 }
  0x6a   : > { %724 = vmatprep.subr.mxu0 %v1006_v2  ;;  %754 = vmatpush3.msra.mxu1 %v464_v40 }
  0x6b   : > { %725 = vmatpush3.msra.mxu0 %v363_v18  ;;  %755 = vmatprep.subr.mxu1 %v1006_v2 }
  0x6c   : > { %726 = vmatprep.subr.mxu0 %v1006_v2  ;;  %756 = vmatpush3.msra.mxu1 %v463_v41 }
  0x6d   : > { %727 = vmatpush3.msra.mxu0 %v362_v19  ;;  %757 = vmatprep.subr.mxu1 %v1006_v2 }
  0x6e   : > { %728 = vmatprep.subr.mxu0 %v1006_v2  ;;  %758 = vmatpush3.msra.mxu1 %v462_v42 }
  0x6f   : > { %729 = vmatpush3.msra.mxu0 %v361_v20  ;;  %759 = vmatprep.subr.mxu1 %v1006_v2 }
  0x70   : > { %730 = vmatprep.subr.mxu0 %v1006_v2  ;;  %760 = vmatpush3.msra.mxu1 %v461_v43 }
  0x71   : > { %731 = vmatpush3.msra.mxu0 %v360_v21  ;;  %761 = vmatprep.subr.mxu1 %v1006_v2 }
  0x72   : > { %732 = vmatprep.subr.mxu0 %v1006_v2  ;;  %762 = vmatpush3.msra.mxu1 %v460_v44 }
  0x73   : > { %733 = vmatpush3.msra.mxu0 %v359_v22  ;;  %763 = vmatprep.subr.mxu1 %v1006_v2 }
  0x74   : > { %734 = vmatprep.subr.mxu0 %v1006_v2  ;;  %764 = vmatpush3.msra.mxu1 %v459_v45 }
  0x75   : > { %735 = vmatpush3.msra.mxu0 %v358_v23  ;;  %765 = vmatprep.subr.mxu1 %v1006_v2 }
  0x76   : > { %736 = vmatprep.subr.mxu0 %v1006_v2  ;;  %766 = vmatpush3.msra.mxu1 %v458_v46 }
  0x77   : > { %737 = vmatpush3.msra.mxu0 %v357_v24  ;;  %767 = vmatprep.subr.mxu1 %v1006_v2 }
  0x78   : > { %768 = vmatpush3.msra.mxu1 %v457_v47 }
  0x79   : > { %769 = vmatprep.subr.mxu1 %v1006_v2 }
  0x7a   : > { %770 = vmatpush3.msra.mxu1 %v456_v48 }
  0x7b   : > { %771 = vmatprep.subr.mxu1 %v1006_v2 }
  0x7c   : > { %772 = vmatpush3.msra.mxu1 %v455_v49 }
  0xe1   : > { %v325_v8 = vpop.xlane.xlu0 %324 }
  0xe2   : > { %v326_v9 = vmul.f32 0.03125, %v325_v8 }
  0xe4   : > { %v327_v10 = vsub.f32 %v323_v0, %v326_v9 }
  0xe6   : > { %v333_v11 = vsel %vm330_vm0, %v327_v10, 0.0 }
  0xe7   : > { %v334_v12 = vmul.f32 %v333_v11, %v333_v11 }
  0xe9   : > { %335 = vadd.xlane.f32.xlu0 %v334_v12 }
 0x172   : > { %v336_v29 = vpop.xlane.xlu0 %335 }
 0x173   : > { %v337_v30 = vmul.f32 0.03125, %v336_v29 }
 0x175   : > { %v338_v31 = vadd.f32 1e-05, %v337_v30 }
 0x177   : > { %847 = vrsqrt.f32 %v338_v31 }
 0x184   : > { %v848_v32 = vpop.eup %847 }
 0x185   : > { %v340_v34 = vmul.f32 %v848_v32, %v333_v11 }
 0x187   : > { %v348_v36 = vmul.f32 %v664_v33, %v340_v34 }
 0x189   : > { %v356_v37 = vadd.f32 %v665_v35, %v348_v36 }
 0x18b   : > { %739 = vmatmul.mubr.f32.vlgmr.msra.gmra.mxu0 %v356_v37 }
 0x24b   : > { %v446_v51 = vpop.f32.mrf.mxu0 }
 0x24c   : > { %v447_v52 = vadd.f32 %v666_v50, %v446_v51 }
 0x24d   : > { %v740_v53 = vpop.f32.mrf.mxu0 }
 0x24e   : > { %v451_v54 = vmul.f32 0.70710677, %v447_v52  ;;  %v450_v56 = vmul.f32 0.5, %v447_v52 }
 0x250   : > { %849 = verf.f32 %v451_v54 }
 0x25d   : > { %v850_v55 = vpop.eup %849 }
 0x25e   : > { %v453_v57 = vadd.f32 1.0, %v850_v55 }
 0x260   : > { %v454_v58 = vmul.f32 %v453_v57, %v450_v56 }
 0x262   : > { %774 = vmatmul.mubr.f32.vlgmr.msra.gmra.mxu1 %v454_v58 }
 0x322   : > { %v544_v60 = vpop.f32.mrf.mxu1 }
 0x323   : > { %v545_v61 = vadd.f32 %v667_v59, %v544_v60 }
 0x324   : > { %v775_v62 = vpop.f32.mrf.mxu1 }
 0x325   : > { %548 = vst [vmem:[%s322_s15] sm:$0xff] %v545_v61 }
 0x326   : > { %944 = shalt.err (!%p941_p9)
}
 0x327   : > { %s945_s20 = scalar_lea.hbm %s1233_s5, 128  ;;  %s949_s22 = scalar_lea.hbm %s1277_s7, 256 }
 0x328   : > { %p946_p13 = scmp.ne.s32.totalorder %s1233_s5, %s945_s20  ;;  %p950_p4 = scmp.lt.s32.totalorder %s1233_s5, %s1277_s7 }
 0x329   : > { %p951_p8 = scmp.lt.s32.totalorder %s949_s22, %s945_s20 }
 0x32a   : > { %p947_p5 = pnand %p946_p13, %p1297_p0 }
 0x32b   : > { %p952_p3 = por %p951_p8, %p950_p4 }
 0x32c   : > { %p948_p10 = pneg %p947_p5 }
 0x32e   : > { %p953_p11 = pnand %p952_p3, %p948_p10 }
 0x330   : > { %956 = shalt.err (!%p953_p11)
}
 0x331   : > { %786 = dma.vmem_to_hbm [thread:$0]  (%p1297_p0), %s564_s19, 128, %s1233_s5, %s550_s30  }
 0x332 PF: > { %s575_s17 = sand.u32 1, %s987_s24   ;;  %p1298_p1 = scmp.ne.s32.totalorder %s1285_s8, 0 }
 0x333   : > { %p1299_p2 = scmp.ge.s32.totalorder %s999_s27, 2  ;;  %s576_s15 = scalar_lea.sflag [#allocation4], %s575_s17 }
 0x335   : > { %p800_p6 = pnand %p1299_p2, %p1298_p1 }
 0x337   : > { %p801_p12 = pneg %p800_p6 }
 0x339   : > { %982 = dma.done.wait (%p801_p12), %s576_s15, 128  }
 0x33a   : > { %984 = vsyncadd (%p801_p12), %s576_s15, 4294967168  ;;  %p21_p7 = scmp.ge.s32.totalorder %s1121_s23, 4   ;;  %s1300_s24 = smov %s991_s25 }
 0x33b   : > { %s1301_s25 = smov %s995_s26  ;;  %s1302_s26 = smov %s1137_s12 }
 0x33c   : > { %s1303_s27 = smov %s1121_s23  ;;  %23 = sbr.rel (!%p21_p7) target bundleno = 9 (0x9), region = 101 }
 0x341   :  { %581 = vsyncpa [#allocation3], 1 }
 0x342   :  { %583 = vsyncpa [#allocation3 + $0x1], 1 }
 0x343   :  { %584 = vsyncpa [#allocation6], 1 }
 0x344   :  { %585 = vsyncpa [#allocation4], 1 }
 0x345   :  { %587 = vsyncpa [#allocation4 + $0x1], 1 }

</bundles_post_ra>
